<compile_context>
chip_gen: v5e
topology: v5e:2x2
jax: 0.10.0
libtpu: 0.0.40
codegen_flags: <defaults>
</compile_context>

<pallas_src>
import jax
import jax.numpy as jnp
import numpy as np
from jax.experimental import pallas as pl
from jax.experimental.pallas import tpu as pltpu


def _make_kernel(C, A, t_tile):
    def kernel(x_ref, w1_ref, b1_ref, w2_ref, b2_ref, out_ref,
               m_sc, d_sc, n1_sc, n2_sc):
        ti = pl.program_id(1)

        @pl.when(ti == 0)
        def _():
            m_sc[...] = jnp.full_like(m_sc, -jnp.inf)
            d_sc[...] = jnp.zeros_like(d_sc)
            n1_sc[...] = jnp.zeros_like(n1_sc)
            n2_sc[...] = jnp.zeros_like(n2_sc)

        x = x_ref[0]                                            # (C, t_tile)

        # linear1 (1x1 conv) + tanh.  b1_ref already folds the (per-batch)
        # global-context contribution, so this is a single (A,C)@(C,T) matmul.
        h = jnp.tanh(
            jnp.dot(w1_ref[...], x, preferred_element_type=jnp.float32)
            + b1_ref[0])                                        # (A, t_tile)

        # linear2 (1x1 conv): per-channel/per-time attention scores.
        s = (jnp.dot(w2_ref[...], h, preferred_element_type=jnp.float32)
             + b2_ref[...])                                     # (C, t_tile)

        # Online softmax-weighted moments over the T axis.
        m_prev = m_sc[...]
        m_new = jnp.maximum(m_prev, jnp.max(s, axis=-1, keepdims=True))
        scale = jnp.exp(m_prev - m_new)
        e = jnp.exp(s - m_new)                                  # (C, t_tile)
        ex = e * x
        d_sc[...] = scale * d_sc[...] + jnp.sum(e, axis=-1, keepdims=True)
        n1_sc[...] = scale * n1_sc[...] + jnp.sum(ex, axis=-1, keepdims=True)
        n2_sc[...] = scale * n2_sc[...] + jnp.sum(ex * x, axis=-1, keepdims=True)
        m_sc[...] = m_new

        @pl.when(ti == pl.num_programs(1) - 1)
        def _():
            inv_d = 1.0 / d_sc[...]                             # (C, 1)
            mean = n1_sc[...] * inv_d
            second = n2_sc[...] * inv_d
            var = second - mean * mean
            std = jnp.sqrt(jnp.maximum(var, 1e-9))
            out_ref[0] = jnp.concatenate([mean, std], axis=0).astype(out_ref.dtype)

    return kernel


def _pick_t_tile(T, max_tile=1024):
    if T <= max_tile:
        return T
    for cand in (1024, 512, 256, 128):
        if T % cand == 0:
            return cand
    return T   # fall back to untiled if no nice divisor


def attentive_stats_pool(x, params, *, global_context_att=False, t_tile=None):
    """x: (B, C, T). params = (w1, b1, w2, b2) with PyTorch Conv1d(k=1) weights
    squeezed: w1 (A, Cin), b1 (A,), w2 (C, A), b2 (C,).  Returns (B, 2C)."""
    w1, b1, w2, b2 = params
    B, C, T = x.shape
    A = w1.shape[0]

    # Hoist per-batch (time-independent) conditioning out of the kernel.
    if global_context_att:
        assert w1.shape[1] == 3 * C
        w1_x, w1_m, w1_s = w1[:, :C], w1[:, C:2 * C], w1[:, 2 * C:]
        ctx_mean = jnp.mean(x, axis=-1)                                  # (B, C)
        ctx_std = jnp.sqrt(jnp.var(x, axis=-1, ddof=1) + 1e-10)          # (B, C)
        b1_eff = b1[None, :] + ctx_mean @ w1_m.T + ctx_std @ w1_s.T      # (B, A)
    else:
        assert w1.shape[1] == C
        w1_x = w1
        b1_eff = jnp.broadcast_to(b1[None, :], (B, A))
    b1_eff = b1_eff[:, :, None]                                          # (B, A, 1)
    b2_col = b2[:, None]                                                 # (C, 1)

    if t_tile is None:
        t_tile = _pick_t_tile(T)
    assert T % t_tile == 0, "T must be a multiple of t_tile"
    n_t = T // t_tile

    kernel = _make_kernel(C, A, t_tile)

    out = pl.pallas_call(
        kernel,
        out_shape=jax.ShapeDtypeStruct((B, 2 * C, 1), x.dtype),
        grid_spec=pltpu.PrefetchScalarGridSpec(
            num_scalar_prefetch=0,
            grid=(B, n_t),
            in_specs=[
                pl.BlockSpec((1, C, t_tile), lambda b, t: (b, 0, t)),    # x
                pl.BlockSpec((A, C), lambda b, t: (0, 0)),               # w1 (x part)
                pl.BlockSpec((1, A, 1), lambda b, t: (b, 0, 0)),         # b1_eff
                pl.BlockSpec((C, A), lambda b, t: (0, 0)),               # w2
                pl.BlockSpec((C, 1), lambda b, t: (0, 0)),               # b2
            ],
            out_specs=pl.BlockSpec((1, 2 * C, 1), lambda b, t: (b, 0, 0)),
            scratch_shapes=[pltpu.VMEM((C, 1), jnp.float32)] * 4,
        ),
        compiler_params=pltpu.CompilerParams(
            dimension_semantics=("parallel", "arbitrary")),
    )(x, w1_x, b1_eff, w2, b2_col)

    return out[:, :, 0]


def ref_forward(x, params, *, global_context_att=False):
    """Pure-JAX reference mirroring the PyTorch forward."""
    w1, b1, w2, b2 = params
    if global_context_att:
        cm = jnp.mean(x, axis=-1, keepdims=True)
        cs = jnp.sqrt(jnp.var(x, axis=-1, keepdims=True, ddof=1) + 1e-10)
        x_in = jnp.concatenate(
            [x, jnp.broadcast_to(cm, x.shape), jnp.broadcast_to(cs, x.shape)], axis=1)
    else:
        x_in = x
    alpha = jnp.tanh(jnp.einsum('ac,bct->bat', w1, x_in) + b1[None, :, None])
    scores = jnp.einsum('ca,bat->bct', w2, alpha) + b2[None, :, None]
    alpha = jax.nn.softmax(scores, axis=2)
    mean = jnp.sum(alpha * x, axis=2)
    residuals = jnp.sum(alpha * x ** 2, axis=2) - mean ** 2
    std = jnp.sqrt(jnp.maximum(residuals, 1e-9))
    return jnp.concatenate([mean, std], axis=1)


if __name__ == "__main__":
    B, C, A, T = 2, 16, 32, 256   # small shapes; T multiple of 128 (lane-dense)

    key = jax.random.PRNGKey(0)
    ks = jax.random.split(key, 6)

    x = jax.random.normal(ks[0], (B, C, T), jnp.float32)

    w1 = jax.random.normal(ks[1], (A, C), jnp.float32) * 0.2
    b1 = jax.random.normal(ks[2], (A,), jnp.float32) * 0.1
    w2 = jax.random.normal(ks[3], (C, A), jnp.float32) * 0.2
    b2 = jax.random.normal(ks[4], (C,), jnp.float32) * 0.1

    # default config: global_context_att=False; t_tile=128 exercises the
    # two-tile online-softmax accumulation path.
    params = (w1, b1, w2, b2)
    out = attentive_stats_pool(x, params, global_context_att=False, t_tile=128)
    out = jax.block_until_ready(out)
    ref = ref_forward(x, params, global_context_att=False)
    np.testing.assert_allclose(np.asarray(out), np.asarray(ref), rtol=1e-4, atol=1e-5)

    # global_context_att=True: linear1 takes [x; context_mean; context_std]
    w1g = jax.random.normal(ks[5], (A, 3 * C), jnp.float32) * 0.2
    params_g = (w1g, b1, w2, b2)
    out_g = attentive_stats_pool(x, params_g, global_context_att=True, t_tile=128)
    out_g = jax.block_until_ready(out_g)
    ref_g = ref_forward(x, params_g, global_context_att=True)
    np.testing.assert_allclose(np.asarray(out_g), np.asarray(ref_g), rtol=1e-4, atol=1e-5)

    print("KERNEL_OK")
</pallas_src>

<mosaic_0001>
module attributes {stable_mosaic.version = 11 : i64} {
  func.func @kernel(%arg0: i32, %arg1: i32, %arg2: memref<1x16x128xf32, #tpu.memory_space<vmem>>, %arg3: memref<32x16xf32, #tpu.memory_space<vmem>>, %arg4: memref<1x32x1xf32, #tpu.memory_space<vmem>>, %arg5: memref<16x32xf32, #tpu.memory_space<vmem>>, %arg6: memref<16x1xf32, #tpu.memory_space<vmem>>, %arg7: memref<1x32x1xf32, #tpu.memory_space<vmem>>, %arg8: memref<16x1xf32, #tpu.memory_space<vmem>>, %arg9: memref<16x1xf32, #tpu.memory_space<vmem>>, %arg10: memref<16x1xf32, #tpu.memory_space<vmem>>, %arg11: memref<16x1xf32, #tpu.memory_space<vmem>>) attributes {dimension_semantics = [#tpu.dimension_semantics<parallel>, #tpu.dimension_semantics<arbitrary>], iteration_bounds = array<i64: 2, 2>, scalar_prefetch = 0 : i64, scratch_operands = 4 : i64, tpu.core_type = #tpu.core_type<tc>, window_params = [{transform_indices = @transform_0, window_bounds = array<i64: 1, 16, 128>}, {pipeline_mode = #tpu.pipeline_mode<synchronous>, transform_indices = @transform_1, window_bounds = array<i64: 32, 16>}, {transform_indices = @transform_2, window_bounds = array<i64: 1, 32, 1>}, {pipeline_mode = #tpu.pipeline_mode<synchronous>, transform_indices = @transform_3, window_bounds = array<i64: 16, 32>}, {pipeline_mode = #tpu.pipeline_mode<synchronous>, transform_indices = @transform_4, window_bounds = array<i64: 16, 1>}, {transform_indices = @transform_5, window_bounds = array<i64: 1, 32, 1>}]} {
    %c0_i32 = arith.constant 0 : i32
    %0 = arith.cmpi eq, %arg1, %c0_i32 : i32
    %1 = arith.extui %0 : i1 to i32
    %c0_i32_0 = arith.constant 0 : i32
    %2 = arith.cmpi ne, %1, %c0_i32_0 : i32
    scf.if %2 {
      %cst_34 = arith.constant 0xFF800000 : f32
      %50 = vector.broadcast %cst_34 : f32 to vector<16x1xf32>
      %c0_35 = arith.constant 0 : index
      %c0_36 = arith.constant 0 : index
      %51 = vector.load %arg8[%c0_35, %c0_36] : memref<16x1xf32, #tpu.memory_space<vmem>>, vector<16x1xf32>
      tpu.vector_store %arg8[%c0_35, %c0_36], %50 {strides = array<i32>} : memref<16x1xf32, #tpu.memory_space<vmem>>, vector<16x1xf32>,
      %cst_37 = arith.constant 0.000000e+00 : f32
      %52 = vector.broadcast %cst_37 : f32 to vector<16x1xf32>
      %c0_38 = arith.constant 0 : index
      %c0_39 = arith.constant 0 : index
      %53 = vector.load %arg9[%c0_38, %c0_39] : memref<16x1xf32, #tpu.memory_space<vmem>>, vector<16x1xf32>
      tpu.vector_store %arg9[%c0_38, %c0_39], %52 {strides = array<i32>} : memref<16x1xf32, #tpu.memory_space<vmem>>, vector<16x1xf32>,
      %cst_40 = arith.constant 0.000000e+00 : f32
      %54 = vector.broadcast %cst_40 : f32 to vector<16x1xf32>
      %c0_41 = arith.constant 0 : index
      %c0_42 = arith.constant 0 : index
      %55 = vector.load %arg10[%c0_41, %c0_42] : memref<16x1xf32, #tpu.memory_space<vmem>>, vector<16x1xf32>
      tpu.vector_store %arg10[%c0_41, %c0_42], %54 {strides = array<i32>} : memref<16x1xf32, #tpu.memory_space<vmem>>, vector<16x1xf32>,
      %cst_43 = arith.constant 0.000000e+00 : f32
      %56 = vector.broadcast %cst_43 : f32 to vector<16x1xf32>
      %c0_44 = arith.constant 0 : index
      %c0_45 = arith.constant 0 : index
      %57 = vector.load %arg11[%c0_44, %c0_45] : memref<16x1xf32, #tpu.memory_space<vmem>>, vector<16x1xf32>
      tpu.vector_store %arg11[%c0_44, %c0_45], %56 {strides = array<i32>} : memref<16x1xf32, #tpu.memory_space<vmem>>, vector<16x1xf32>,
    } else {
    }
    %c0 = arith.constant 0 : index
    %c0_1 = arith.constant 0 : index
    %c0_2 = arith.constant 0 : index
    %3 = vector.load %arg2[%c0, %c0_1, %c0_2] : memref<1x16x128xf32, #tpu.memory_space<vmem>>, vector<1x16x128xf32>
    %4 = vector.shape_cast %3 : vector<1x16x128xf32> to vector<16x128xf32>
    %c0_3 = arith.constant 0 : index
    %c0_4 = arith.constant 0 : index
    %5 = vector.load %arg3[%c0_3, %c0_4] : memref<32x16xf32, #tpu.memory_space<vmem>>, vector<32x16xf32>
    %cst = arith.constant dense<0.000000e+00> : vector<32x128xf32>
    %6 = tpu.matmul %5, %4, %cst {dimension_numbers = #tpu.dot_dimension_numbers<[1], [0], [0], [1], [0, 0, 1, 1], [], []>} : vector<32x16xf32>, vector<16x128xf32>, vector<32x128xf32> -> vector<32x128xf32>
    %c0_5 = arith.constant 0 : index
    %c0_6 = arith.constant 0 : index
    %c0_7 = arith.constant 0 : index
    %7 = vector.load %arg4[%c0_5, %c0_6, %c0_7] : memref<1x32x1xf32, #tpu.memory_space<vmem>>, vector<1x32x1xf32>
    %8 = vector.shape_cast %7 : vector<1x32x1xf32> to vector<32x1xf32>
    %9 = vector.broadcast %8 : vector<32x1xf32> to vector<32x128xf32>
    %10 = arith.addf %6, %9 : vector<32x128xf32>
    %11 = math.tanh %10 : vector<32x128xf32>
    %c0_8 = arith.constant 0 : index
    %c0_9 = arith.constant 0 : index
    %12 = vector.load %arg5[%c0_8, %c0_9] : memref<16x32xf32, #tpu.memory_space<vmem>>, vector<16x32xf32>
    %cst_10 = arith.constant dense<0.000000e+00> : vector<16x128xf32>
    %13 = tpu.matmul %12, %11, %cst_10 {dimension_numbers = #tpu.dot_dimension_numbers<[1], [0], [0], [1], [0, 0, 1, 1], [], []>} : vector<16x32xf32>, vector<32x128xf32>, vector<16x128xf32> -> vector<16x128xf32>
    %c0_11 = arith.constant 0 : index
    %c0_12 = arith.constant 0 : index
    %14 = vector.load %arg6[%c0_11, %c0_12] : memref<16x1xf32, #tpu.memory_space<vmem>>, vector<16x1xf32>
    %15 = vector.broadcast %14 : vector<16x1xf32> to vector<16x128xf32>
    %16 = arith.addf %13, %15 : vector<16x128xf32>
    %c0_13 = arith.constant 0 : index
    %c0_14 = arith.constant 0 : index
    %17 = vector.load %arg8[%c0_13, %c0_14] : memref<16x1xf32, #tpu.memory_space<vmem>>, vector<16x1xf32>
    %cst_15 = arith.constant dense<0xFF800000> : vector<16xf32>
    %18 = vector.multi_reduction <maximumf>, %16, %cst_15 [1] : vector<16x128xf32> to vector<16xf32>
    %19 = vector.shape_cast %18 : vector<16xf32> to vector<16x1xf32>
    %20 = arith.maximumf %17, %19 : vector<16x1xf32>
    %21 = arith.subf %17, %20 : vector<16x1xf32>
    %22 = math.exp %21 : vector<16x1xf32>
    %23 = vector.broadcast %20 : vector<16x1xf32> to vector<16x128xf32>
    %24 = arith.subf %16, %23 : vector<16x128xf32>
    %25 = math.exp %24 : vector<16x128xf32>
    %26 = arith.mulf %25, %4 : vector<16x128xf32>
    %c0_16 = arith.constant 0 : index
    %c0_17 = arith.constant 0 : index
    %27 = vector.load %arg9[%c0_16, %c0_17] : memref<16x1xf32, #tpu.memory_space<vmem>>, vector<16x1xf32>
    %28 = arith.mulf %22, %27 : vector<16x1xf32>
    %cst_18 = arith.constant dense<0.000000e+00> : vector<16xf32>
    %29 = vector.multi_reduction <add>, %25, %cst_18 [1] : vector<16x128xf32> to vector<16xf32>
    %30 = vector.shape_cast %29 : vector<16xf32> to vector<16x1xf32>
    %31 = arith.addf %28, %30 : vector<16x1xf32>
    %c0_19 = arith.constant 0 : index
    %c0_20 = arith.constant 0 : index
    %32 = vector.load %arg9[%c0_19, %c0_20] : memref<16x1xf32, #tpu.memory_space<vmem>>, vector<16x1xf32>
    tpu.vector_store %arg9[%c0_19, %c0_20], %31 {strides = array<i32>} : memref<16x1xf32, #tpu.memory_space<vmem>>, vector<16x1xf32>,
    %c0_21 = arith.constant 0 : index
    %c0_22 = arith.constant 0 : index
    %33 = vector.load %arg10[%c0_21, %c0_22] : memref<16x1xf32, #tpu.memory_space<vmem>>, vector<16x1xf32>
    %34 = arith.mulf %22, %33 : vector<16x1xf32>
    %cst_23 = arith.constant dense<0.000000e+00> : vector<16xf32>
    %35 = vector.multi_reduction <add>, %26, %cst_23 [1] : vector<16x128xf32> to vector<16xf32>
    %36 = vector.shape_cast %35 : vector<16xf32> to vector<16x1xf32>
    %37 = arith.addf %34, %36 : vector<16x1xf32>
    %c0_24 = arith.constant 0 : index
    %c0_25 = arith.constant 0 : index
    %38 = vector.load %arg10[%c0_24, %c0_25] : memref<16x1xf32, #tpu.memory_space<vmem>>, vector<16x1xf32>
    tpu.vector_store %arg10[%c0_24, %c0_25], %37 {strides = array<i32>} : memref<16x1xf32, #tpu.memory_space<vmem>>, vector<16x1xf32>,
    %c0_26 = arith.constant 0 : index
    %c0_27 = arith.constant 0 : index
    %39 = vector.load %arg11[%c0_26, %c0_27] : memref<16x1xf32, #tpu.memory_space<vmem>>, vector<16x1xf32>
    %40 = arith.mulf %22, %39 : vector<16x1xf32>
    %41 = arith.mulf %26, %4 : vector<16x128xf32>
    %cst_28 = arith.constant dense<0.000000e+00> : vector<16xf32>
    %42 = vector.multi_reduction <add>, %41, %cst_28 [1] : vector<16x128xf32> to vector<16xf32>
    %43 = vector.shape_cast %42 : vector<16xf32> to vector<16x1xf32>
    %44 = arith.addf %40, %43 : vector<16x1xf32>
    %c0_29 = arith.constant 0 : index
    %c0_30 = arith.constant 0 : index
    %45 = vector.load %arg11[%c0_29, %c0_30] : memref<16x1xf32, #tpu.memory_space<vmem>>, vector<16x1xf32>
    tpu.vector_store %arg11[%c0_29, %c0_30], %44 {strides = array<i32>} : memref<16x1xf32, #tpu.memory_space<vmem>>, vector<16x1xf32>,
    %c0_31 = arith.constant 0 : index
    %c0_32 = arith.constant 0 : index
    %46 = vector.load %arg8[%c0_31, %c0_32] : memref<16x1xf32, #tpu.memory_space<vmem>>, vector<16x1xf32>
    tpu.vector_store %arg8[%c0_31, %c0_32], %20 {strides = array<i32>} : memref<16x1xf32, #tpu.memory_space<vmem>>, vector<16x1xf32>,
    %c1_i32 = arith.constant 1 : i32
    %47 = arith.cmpi eq, %arg1, %c1_i32 : i32
    %48 = arith.extui %47 : i1 to i32
    %c0_i32_33 = arith.constant 0 : i32
    %49 = arith.cmpi ne, %48, %c0_i32_33 : i32
    scf.if %49 {
      %c0_34 = arith.constant 0 : index
      %c0_35 = arith.constant 0 : index
      %50 = vector.load %arg9[%c0_34, %c0_35] : memref<16x1xf32, #tpu.memory_space<vmem>>, vector<16x1xf32>
      %cst_36 = arith.constant 1.000000e+00 : f32
      %51 = vector.broadcast %cst_36 : f32 to vector<16x1xf32>
      %52 = arith.divf %51, %50 : vector<16x1xf32>
      %c0_37 = arith.constant 0 : index
      %c0_38 = arith.constant 0 : index
      %53 = vector.load %arg10[%c0_37, %c0_38] : memref<16x1xf32, #tpu.memory_space<vmem>>, vector<16x1xf32>
      %54 = arith.mulf %53, %52 : vector<16x1xf32>
      %c0_39 = arith.constant 0 : index
      %c0_40 = arith.constant 0 : index
      %55 = vector.load %arg11[%c0_39, %c0_40] : memref<16x1xf32, #tpu.memory_space<vmem>>, vector<16x1xf32>
      %56 = arith.mulf %55, %52 : vector<16x1xf32>
      %57 = arith.mulf %54, %54 : vector<16x1xf32>
      %58 = arith.subf %56, %57 : vector<16x1xf32>
      %cst_41 = arith.constant 9.99999971E-10 : f32
      %59 = vector.broadcast %cst_41 : f32 to vector<16x1xf32>
      %60 = arith.maximumf %58, %59 : vector<16x1xf32>
      %61 = math.sqrt %60 : vector<16x1xf32>
      %62 = tpu.concatenate %54, %61 in 0 : vector<16x1xf32>, vector<16x1xf32> -> vector<32x1xf32>
      %c0_42 = arith.constant 0 : index
      %c0_43 = arith.constant 0 : index
      %c0_44 = arith.constant 0 : index
      %63 = vector.load %arg7[%c0_42, %c0_43, %c0_44] : memref<1x32x1xf32, #tpu.memory_space<vmem>>, vector<1x32x1xf32>
      %64 = vector.shape_cast %63 : vector<1x32x1xf32> to vector<32x1xf32>
      %65 = vector.shape_cast %62 : vector<32x1xf32> to vector<1x32x1xf32>
      tpu.vector_store %arg7[%c0_42, %c0_43, %c0_44], %65 {strides = array<i32>} : memref<1x32x1xf32, #tpu.memory_space<vmem>>, vector<1x32x1xf32>,
    } else {
    }
    return
  }
  func.func @transform_0(%arg0: i32, %arg1: i32) -> (i32, i32, i32) {
    %c0_i32 = arith.constant 0 : i32
    %c0_i32_0 = arith.constant 0 : i32
    return %arg0, %c0_i32, %arg1 : i32, i32, i32
  }
  func.func @transform_1(%arg0: i32, %arg1: i32) -> (i32, i32) {
    %c0_i32 = arith.constant 0 : i32
    %c0_i32_0 = arith.constant 0 : i32
    %c0_i32_1 = arith.constant 0 : i32
    return %c0_i32, %c0_i32_0 : i32, i32
  }
  func.func @transform_2(%arg0: i32, %arg1: i32) -> (i32, i32, i32) {
    %c0_i32 = arith.constant 0 : i32
    %c0_i32_0 = arith.constant 0 : i32
    %c0_i32_1 = arith.constant 0 : i32
    return %arg0, %c0_i32, %c0_i32_0 : i32, i32, i32
  }
  func.func @transform_3(%arg0: i32, %arg1: i32) -> (i32, i32) {
    %c0_i32 = arith.constant 0 : i32
    %c0_i32_0 = arith.constant 0 : i32
    %c0_i32_1 = arith.constant 0 : i32
    return %c0_i32, %c0_i32_0 : i32, i32
  }
  func.func @transform_4(%arg0: i32, %arg1: i32) -> (i32, i32) {
    %c0_i32 = arith.constant 0 : i32
    %c0_i32_0 = arith.constant 0 : i32
    %c0_i32_1 = arith.constant 0 : i32
    return %c0_i32, %c0_i32_0 : i32, i32
  }
  func.func @transform_5(%arg0: i32, %arg1: i32) -> (i32, i32, i32) {
    %c0_i32 = arith.constant 0 : i32
    %c0_i32_0 = arith.constant 0 : i32
    %c0_i32_1 = arith.constant 0 : i32
    return %arg0, %c0_i32, %c0_i32_0 : i32, i32, i32
  }
}

</mosaic_0001>

<bundles_post_ra>
// kernel: tpu_custom_call.1
= control target key start
LH: loop header
LB: loop body
LE: loop exit
PB: predicated region body
PF: predicated region fallthrough
CT: control target
= control target key end

     0   :  { %s876_s18 = smov 0   ;;  %s878_s19 = smov 0   ;;  %s1034_s0 = inlined_call_operand.vmem [shape: f32[2,16,256], index: 0, kind: input, shape index: {}]   ;;  %s1035_s1 = inlined_call_operand.vmem [shape: f32[32,16], index: 1, kind: input, shape index: {}]   ;;  %s1036_s2 = inlined_call_operand.vmem [shape: f32[2,32,1], index: 2, kind: input, shape index: {}]   ;;  %s1037_s3 = inlined_call_operand.vmem [shape: f32[16,32], index: 3, kind: input, shape index: {}]   ;;  %s1038_s4 = inlined_call_operand.vmem [shape: f32[16,1], index: 4, kind: input, shape index: {}]   ;;  %s1039_s5 = inlined_call_operand.vmem [shape: f32[2,32,1], index: 5, kind: output, shape index: {}]  }
   0x1   :  { %s880_s20 = smov 0   ;;  %s882_s21 = smov 0  }
   0x2   :  { %s884_s22 = smov 0   ;;  %s886_s23 = smov 0  }
   0x3   :  { %s888_s24 = smov 0  }
   0x4 LB: > { %s24_s25 = sadd.s32 1, %s833_s22  ;;  %s27_s26 = sadd.s32 1, %s837_s23  ;;  %s841_s24 = sphi %s888_s24, %s15_s24   ;;  %s837_s23 = sphi %s886_s23, %s1045_s23   ;;  %s833_s22 = sphi %s884_s22, %s1044_s22   ;;  %s829_s21 = sphi %s882_s21, %s1043_s21   ;;  %s825_s20 = sphi %s880_s20, %s1042_s20   ;;  %s821_s19 = sphi %s878_s19, %s1041_s19   ;;  %s817_s18 = sphi %s876_s18, %s1040_s18  }
   0x5   : > { %p25_p0 = scmp.ge.s32.totalorder %s24_s25, 2  ;;  %p43_p1 = scmp.ne.s32.totalorder %s821_s19, %s817_s18 }
   0x6   : > { %p44_p2 = scmp.eq.s32.totalorder %s841_s24, 0  ;;  %s36_s30 = sadd.s32 1, %s821_s19 }
   0x7   : > { %s1047_s25 = smov (%p25_p0, %s24_s25), 0  ;;  %s1049_s26 = smov (!%p25_p0, %s27_s26), %s837_s23 }
   0x8   : > { %p45_p3 = por %p44_p2, %p43_p1  ;;  %p29_p4 = scmp.ge.s32.totalorder %s1049_s26, 2 }
   0x9   : > { %s32_s27 = ssub.s32 %s833_s22, %s1047_s25  ;;  %p673_p6 = scmp.ge.s32.totalorder %s841_s24, 4 }
   0xa   : > { %s1051_s26 = smov (%p29_p4, %s1049_s26), 0 }
   0xb   : > { %s31_s28 = ssub.s32 %s837_s23, %s1051_s26  ;;  %193 = sbr.rel (%p673_p6) target bundleno = 24 (0x18), region = 28 }
   0xc   : > { %s33_s29 = sor.u32 %s32_s27, %s31_s28 }
   0xd   : > { %p34_p5 = scmp.eq.s32.totalorder %s33_s29, 0 }
   0xf   : > { %s927_s6 = scalar_select %p34_p5, %s821_s19, %s36_s30  }
  0x10   : > { %196 = sbr.rel (!%p45_p3) target bundleno = 24 (0x18), region = 32  ;;  %s198_s7 = sand.u32 (%p45_p3), 1, %s821_s19  }
  0x11   : > { %s675_s8 = sshll.u32 (%p45_p3), %s837_s23, 2  ;;  %s674_s9 = sshll.u32 (%p45_p3), %s198_s7, 4 }
  0x12   : > { %s202_s10 = sadd.s32 (%p45_p3), %s833_s22, %s675_s8  ;;  %s200_s15 = scalar_lea.vmem (%p45_p3), [#allocation6], %s674_s9 }
  0x13   : > { %s676_s11 = sshll.u32 (%p45_p3), %s202_s10, 3 }
  0x14   : > { %s204_s14 = scalar_lea.vmem (%p45_p3), %s1034_s0, %s676_s11 }
  0x15   : > { %v235_v0 = vld [vmem:[%s204_s14] sm:$0xff]  ;;  %v237_v1 = vld [vmem:[%s204_s14 + $0x10] sm:$0xff] }
  0x16   : > { %236 = vst [vmem:[%s200_s15] sm:$0xff] %v235_v0 }
  0x17   : > { %238 = vst [vmem:[%s200_s15 + $0x8] sm:$0xff] %v237_v1 }
  0x18 PF: > { %p677_p7 = scmp.ge.s32.totalorder %s841_s24, 1  ;;  %p251_p8 = scmp.lt.s32.totalorder %s841_s24, 5 }
  0x1a   : > { %p252_p9 = pnand %p677_p7, %p251_p8 }
  0x1b   : > { %s258_s16 = sand.u32 (!%p252_p9), 1, %s817_s18   ;;  %p290_p10 = scmp.lt.s32.totalorder (!%p252_p9), %s829_s21, 1 }
  0x1c   : > { %255 = sbr.rel (%p252_p9) target bundleno = 739 (0x2e3), region = 74  ;;  %s678_s17 = sshll.u32 (!%p252_p9), %s258_s16, 4 }
  0x1d   : > { %s260_s10 = scalar_lea.vmem (!%p252_p9), [#allocation6], %s678_s17  ;;  %p683_p11 = scmp.ne.s32.totalorder (!%p252_p9), %s825_s20, 0 }
  0x21   : > { %s1053_s21 = smov (!%p290_p10, %s829_s21), 1  ;;  %303 = sbr.rel (%p683_p11) target bundleno = 47 (0x2f), region = 82 }
  0x22   : > { %s693_s27 = sshll.u32 %s1053_s21, 5 }
  0x23   : > { %s944_s30 = scalar_lea.vmem %s1036_s2, %s693_s27  ;;  %s949_s9 = scalar_lea.vmem %s1039_s5, %s693_s27 }
  0x26   : > { %vm304_vm0 = vcmask 7168   ;;  %v843_v2 = vmov -inf   ;;  %v844_v3 = vmov 0.0  }
  0x27   : > { %305 = vst.msk [vmem:[#allocation2] sm:$0xff] %vm304_vm0, %v843_v2 }
  0x28   : > { %306 = vst.msk [vmem:[#allocation2 + $0x8] sm:$0xff] %vm304_vm0, %v843_v2 }
  0x29   : > { %307 = vst.msk [vmem:[#allocation3] sm:$0xff] %vm304_vm0, %v844_v3 }
  0x2a   : > { %308 = vst.msk [vmem:[#allocation3 + $0x8] sm:$0xff] %vm304_vm0, %v844_v3 }
  0x2b   : > { %309 = vst.msk [vmem:[#allocation4] sm:$0xff] %vm304_vm0, %v844_v3 }
  0x2c   : > { %310 = vst.msk [vmem:[#allocation4 + $0x8] sm:$0xff] %vm304_vm0, %v844_v3 }
  0x2d   : > { %311 = vst.msk [vmem:[#allocation5] sm:$0xff] %vm304_vm0, %v844_v3 }
  0x2e   : > { %312 = vst.msk [vmem:[#allocation5 + $0x8] sm:$0xff] %vm304_vm0, %v844_v3 }
  0x2f PF: > { %v952_v4 = vld [vmem:[%s260_s10 + $0x8] sm:$0xff]  ;;  %v954_v5 = vld [vmem:[%s260_s10] sm:$0xff]  ;;  %vm343_vm1 = vcmask 130048   ;;  %v845_v8 = vmov 0   ;;  %vm403_vm2 = vcmask 261120   ;;  %vm475_vm3 = vcmask 7168  }
  0x30   : > { %695 = vmatpush.msra.mxu2 %v952_v4  ;;  %v317_v6 = vld [vmem:[%s1035_s1 + $0x10] sm:$0xff]  ;;  %370 = vmatpush.msra.mxu0 %v952_v4  ;;  %v315_v7 = vld [vmem:[%s1035_s1] sm:$0xff]  ;;  %v322_v9 = vld [vmem:[%s944_s30 + $0x18] sm:$0xff]  ;;  %p690_p12 = scmp.ne.s32.totalorder %s825_s20, 1 }
  0x31   : > { %760 = vset.pattern.permute.xlu0 %v845_v8  ;;  %761 = vset.pattern.permute.xlu1 %v845_v8  ;;  %v320_v10 = vld [vmem:[%s944_s30 + $0x8] sm:$0xff]  ;;  %v318_v11 = vld [vmem:[%s1035_s1 + $0x18] sm:$0xff]  ;;  %v321_v13 = vld [vmem:[%s944_s30 + $0x10] sm:$0xff] }
  0x32   : > { %696 = vmatpush.msra.mxu2 %v954_v5  ;;  %371 = vmatpush.msra.mxu0 %v954_v5  ;;  %v316_v12 = vld [vmem:[%s1035_s1 + $0x8] sm:$0xff]  ;;  %v319_v14 = vld [vmem:[%s944_s30] sm:$0xff]  ;;  %v465_v0 = vld [vmem:[#allocation3] sm:$0xff] }
  0x33   : > { %686 = vmatmul.msk.f32.vlgmr.msra.gmra.mxu2 %vm343_vm1, %v317_v6  ;;  %684 = vmatmul.msk.f32.vlgmr.msra.gmra.mxu0 %vm343_vm1, %v315_v7  ;;  %v391_v15 = vld [vmem:[%s1038_s4] sm:$0xff]  ;;  %v392_v18 = vld [vmem:[%s1038_s4 + $0x8] sm:$0xff] }
  0x34   : > { %340 = vperm.xlu0 %760, %v322_v9   ;;  %330 = vperm.xlu1 %761, %v320_v10   ;;  %v389_v32 = vld [vmem:[%s1037_s3] sm:$0xff]  ;;  %v390_v33 = vld [vmem:[%s1037_s3 + $0x8] sm:$0xff]  ;;  %v466_v10 = vld [vmem:[#allocation3 + $0x8] sm:$0xff] }
  0x35   : > { %762 = vset.pattern.permute.xlu2 %v845_v8  ;;  %v433_v41 = vld [vmem:[#allocation2] sm:$0xff]  ;;  %v434_v45 = vld [vmem:[#allocation2 + $0x8] sm:$0xff] }
  0x36   : > { %395 = vperm.xlu2 %762, %v391_v15   ;;  %v478_v1 = vld [vmem:[#allocation4] sm:$0xff] }
  0x3b   : > { %687 = vmatmul.msk.f32.gmra.mxu2 %vm343_vm1, %v318_v11  ;;  %685 = vmatmul.msk.f32.gmra.mxu0 %vm343_vm1, %v316_v12 }
  0x3c   : > { %335 = vperm.xlu0 %760, %v321_v13   ;;  %325 = vperm.xlu1 %761, %v319_v14   ;;  %v491_v13 = vld [vmem:[#allocation5 + $0x8] sm:$0xff] }
  0x3e   : > { %400 = vperm.xlu2 %762, %v392_v18  }
  0x90   : > { %v396_v35 = vpop.permute.xlu2 %395 }
  0x98   : > { %v401_v38 = vpop.permute.xlu2 %400 }
  0xa6   : > { %v341_v16 = vpop.permute.xlu0 %340  ;;  %v331_v19 = vpop.permute.xlu1 %330 }
  0xae   : > { %v336_v21 = vpop.permute.xlu0 %335  ;;  %v326_v26 = vpop.permute.xlu1 %325 }
  0xb0   : > { %v373_v17 = vpop.f32.mrf.mxu0 }
  0xb1   : > { %v374_v28 = vadd.f32 %v373_v17, %v326_v26 }
  0xb6   : > { %v379_v20 = vpop.f32.mrf.mxu2 }
  0xb7   : > { %v380_v24 = vadd.f32 %v379_v20, %v336_v21  ;;  %v479_v20 = vld [vmem:[#allocation4 + $0x8] sm:$0xff] }
  0xb8   : > { %v376_v22 = vpop.f32.mrf.mxu0 }
  0xb9   : > { %v377_v27 = vadd.f32 %v376_v22, %v331_v19 }
  0xbe   : > { %v382_v23 = vpop.f32.mrf.mxu2 }
  0xbf   : > { %v383_v25 = vadd.f32 %v382_v23, %v341_v16 }
  0xc1   : > { %763 = vtanh.f32 %v383_v25 }
  0xc2   : > { %765 = vtanh.f32 %v380_v24 }
  0xc3   : > { %767 = vtanh.f32 %v377_v27 }
  0xc4   : > { %769 = vtanh.f32 %v374_v28 }
  0xc7   : > { %v764_v29 = vpop.eup %763 }
  0xc8   : > { %422 = vmatpush.msra.mxu1 %v764_v29  ;;  %697 = vmatpush.msra.mxu3 %v764_v29  ;;  %v766_v30 = vpop.eup %765 }
  0xc9   : > { %v768_v31 = vpop.eup %767 }
  0xca   : > { %423 = vmatpush.msra.mxu1 %v766_v30  ;;  %698 = vmatpush.msra.mxu3 %v766_v30  ;;  %v770_v34 = vpop.eup %769 }
  0xcc   : > { %424 = vmatpush.msra.mxu1 %v768_v31  ;;  %699 = vmatpush.msra.mxu3 %v768_v31 }
  0xce   : > { %425 = vmatpush.msra.mxu1 %v770_v34  ;;  %700 = vmatpush.msra.mxu3 %v770_v34 }
  0xcf   : > { %688 = vmatmul.msk.f32.vlgmr.msra.gmra.mxu1 %vm403_vm2, %v389_v32  ;;  %689 = vmatmul.msk.f32.vlgmr.msra.gmra.mxu3 %vm403_vm2, %v390_v33 }
 0x14c   : > { %v427_v36 = vpop.f32.mrf.mxu1 }
 0x14d   : > { %v428_v37 = vadd.f32 %v427_v36, %v396_v35 }
 0x14f   : > { %435 = vmax.xlane.f32.xlu0 %v428_v37 }
 0x152   : > { %v430_v39 = vpop.f32.mrf.mxu3 }
 0x153   : > { %v431_v40 = vadd.f32 %v430_v39, %v401_v38 }
 0x155   : > { %437 = vmax.xlane.f32.xlu1 %v431_v40 }
 0x1c2   : > { %v436_v42 = vpop.xlane.xlu0 %435 }
 0x1c3   : > { %v439_v43 = vmax.f32 %v433_v41, %v436_v42 }
 0x1c5   : > { %v441_v44 = vsub.f32 %v433_v41, %v439_v43  ;;  %504 = vst.msk [vmem:[#allocation2] sm:$0xff] %vm475_vm3, %v439_v43  ;;  %449 = vperm.xlu2 %762, %v439_v43  }
 0x1c7   : > { %v443_v61 = vmul.f32 1.442695, %v441_v44 }
 0x1c8   : > { %v438_v46 = vpop.xlane.xlu1 %437 }
 0x1c9   : > { %v440_v47 = vmax.f32 %v434_v45, %v438_v46 }
 0x1cb   : > { %v442_v48 = vsub.f32 %v434_v45, %v440_v47  ;;  %505 = vst.msk [vmem:[#allocation2 + $0x8] sm:$0xff] %vm475_vm3, %v440_v47 }
 0x1cd   : > { %454 = vperm.xlu2 %762, %v440_v47   ;;  %v445_v62 = vmul.f32 1.442695, %v442_v48 }
 0x21f   : > { %v450_v49 = vpop.permute.xlu2 %449 }
 0x220   : > { %v457_v50 = vsub.f32 %v428_v37, %v450_v49 }
 0x222   : > { %v459_v51 = vmul.f32 1.442695, %v457_v50 }
 0x224   : > { %771 = vpow2.f32 %v459_v51 }
 0x227   : > { %v455_v52 = vpop.permute.xlu2 %454 }
 0x228   : > { %v458_v53 = vsub.f32 %v431_v40, %v455_v52 }
 0x22a   : > { %v772_v54 = vpop.eup %771  ;;  %v461_v55 = vmul.f32 1.442695, %v458_v53 }
 0x22b   : > { %469 = vadd.xlane.f32.xlu2 %v772_v54  ;;  %v463_v56 = vmul.f32 %v772_v54, %v954_v5 }
 0x22c   : > { %773 = vpow2.f32 %v461_v55 }
 0x22d   : > { %482 = vadd.xlane.f32.xlu1 %v463_v56  ;;  %v494_v58 = vmul.f32 %v463_v56, %v954_v5  ;;  %775 = vpow2.f32 %v443_v61 }
 0x22e   : > { %777 = vpow2.f32 %v445_v62 }
 0x232   : > { %v774_v57 = vpop.eup %773 }
 0x233   : > { %471 = vadd.xlane.f32.xlu0 %v774_v57  ;;  %v464_v59 = vmul.f32 %v774_v57, %v952_v4  ;;  %v776_v63 = vpop.eup %775 }
 0x234   : > { %v467_v2 = vmul.f32 %v776_v63, %v465_v0  ;;  %v480_v7 = vmul.f32 %v776_v63, %v478_v1  ;;  %v778_v9 = vpop.eup %777 }
 0x235   : > { %496 = vadd.xlane.f32.xlu1 %v494_v58  ;;  %v495_v60 = vmul.f32 %v464_v59, %v952_v4  ;;  %v490_v4 = vld [vmem:[#allocation5] sm:$0xff]  ;;  %v468_v11 = vmul.f32 %v778_v9, %v466_v10  ;;  %v493_v18 = vmul.f32 %v778_v9, %v491_v13  ;;  %v481_v22 = vmul.f32 %v778_v9, %v479_v20 }
 0x236   : > { %v492_v15 = vmul.f32 %v776_v63, %v490_v4 }
 0x237   : > { %498 = vadd.xlane.f32.xlu2 %v495_v60 }
 0x23b   : > { %484 = vadd.xlane.f32.xlu0 %v464_v59 }
 0x29e   : > { %v470_v3 = vpop.xlane.xlu2 %469 }
 0x29f   : > { %v473_v6 = vadd.f32 %v470_v3, %v467_v2 }
 0x2a0   : > { %v483_v8 = vpop.xlane.xlu1 %482 }
 0x2a1   : > { %476 = vst.msk [vmem:[#allocation3] sm:$0xff] %vm475_vm3, %v473_v6  ;;  %v486_v5 = vadd.f32 %v483_v8, %v480_v7 }
 0x2a3   : > { %488 = vst.msk [vmem:[#allocation4] sm:$0xff] %vm475_vm3, %v486_v5 }
 0x2a6   : > { %v472_v12 = vpop.xlane.xlu0 %471 }
 0x2a7   : > { %v474_v14 = vadd.f32 %v472_v12, %v468_v11 }
 0x2a8   : > { %v497_v16 = vpop.xlane.xlu1 %496 }
 0x2a9   : > { %477 = vst.msk [vmem:[#allocation3 + $0x8] sm:$0xff] %vm475_vm3, %v474_v14  ;;  %v500_v17 = vadd.f32 %v497_v16, %v492_v15 }
 0x2aa   : > { %v499_v19 = vpop.xlane.xlu2 %498 }
 0x2ab   : > { %502 = vst.msk [vmem:[#allocation5] sm:$0xff] %vm475_vm3, %v500_v17  ;;  %v501_v21 = vadd.f32 %v499_v19, %v493_v18 }
 0x2ad   : > { %503 = vst.msk [vmem:[#allocation5 + $0x8] sm:$0xff] %vm475_vm3, %v501_v21  ;;  %509 = sbr.rel (%p690_p12) target bundleno = 739 (0x2e3), region = 86 }
 0x2ae   : > { %v485_v23 = vpop.xlane.xlu0 %484 }
 0x2af   : > { %v487_v24 = vadd.f32 %v485_v23, %v481_v22 }
 0x2b1   : > { %489 = vst.msk [vmem:[#allocation4 + $0x8] sm:$0xff] %vm475_vm3, %v487_v24 }
 0x2b2   : > { %v510_v25 = vld [vmem:[#allocation3] sm:$0xff]  ;;  %v511_v26 = vld [vmem:[#allocation3 + $0x8] sm:$0xff]  ;;  %v542_v42 = vld [vmem:[#allocation4] sm:$0xff] }
 0x2b3   : > { %779 = vrcp.f32 %v510_v25  ;;  %vm517_vm4 = vweird.f32 %v510_v25  ;;  %v523_v30 = vand.u32 2147483648, %v510_v25  ;;  %v521_v33 = vand.u32 2147483647, %v510_v25  ;;  %v546_v43 = vld [vmem:[#allocation5] sm:$0xff] }
 0x2b4   : > { %781 = vrcp.f32 %v511_v26  ;;  %v538_v34 = vand.u32 2147483648, %v511_v26  ;;  %vm532_vm6 = vweird.f32 %v511_v26  ;;  %v536_v36 = vand.u32 2147483647, %v511_v26  ;;  %v547_v47 = vld [vmem:[#allocation5 + $0x8] sm:$0xff] }
 0x2b5   : > { %v524_v38 = vor.u32 1.1754944e-38, %v523_v30  ;;  %vm522_vm9 = vcmp.eq.f32.partialorder %v521_v33, 8.507059e+37 }
 0x2b6   : > { %v539_v41 = vor.u32 1.1754944e-38, %v538_v34  ;;  %vm537_vm11 = vcmp.eq.f32.partialorder %v536_v36, 8.507059e+37 }
 0x2b8   : > { %v543_v46 = vld [vmem:[#allocation4 + $0x8] sm:$0xff] }
 0x2b9   : > { %v780_v27 = vpop.eup %779 }
 0x2ba   : > { %v782_v28 = vpop.eup %781  ;;  %v513_v29 = vmul.f32 %v780_v27, %v510_v25  ;;  %vm518_vm5 = vweird.f32 %v780_v27 }
 0x2bb   : > { %v528_v31 = vmul.f32 %v782_v28, %v511_v26  ;;  %vm533_vm7 = vweird.f32 %v782_v28  ;;  %vm519_vm8 = vmor %vm517_vm4, %vm518_vm5 }
 0x2bc   : > { %v514_v32 = vsub.f32 1.0, %v513_v29  ;;  %vm534_vm10 = vmor %vm532_vm6, %vm533_vm7 }
 0x2bd   : > { %v529_v35 = vsub.f32 1.0, %v528_v31 }
 0x2be   : > { %v515_v37 = vmul.f32 %v780_v27, %v514_v32 }
 0x2bf   : > { %v530_v39 = vmul.f32 %v782_v28, %v529_v35 }
 0x2c0   : > { %v516_v40 = vadd.f32 %v780_v27, %v515_v37 }
 0x2c1   : > { %v531_v44 = vadd.f32 %v782_v28, %v530_v39 }
 0x2c2   : > { %v520_v45 = vsel %vm519_vm8, %v780_v27, %v516_v40 }
 0x2c3   : > { %v525_v48 = vsel %vm522_vm9, %v524_v38, %v520_v45  ;;  %v535_v49 = vsel %vm534_vm10, %v782_v28, %v531_v44 }
 0x2c4   : > { %v544_v50 = vmul.f32 %v542_v42, %v525_v48  ;;  %v548_v51 = vmul.f32 %v546_v43, %v525_v48  ;;  %v540_v52 = vsel %vm537_vm11, %v539_v41, %v535_v49 }
 0x2c5   : > { %v545_v53 = vmul.f32 %v543_v46, %v540_v52  ;;  %v549_v54 = vmul.f32 %v547_v47, %v540_v52 }
 0x2c6   : > { %v550_v55 = vmul.f32 %v544_v50, %v544_v50  ;;  %580 = vst.msk [vmem:[%s949_s9] sm:$0xff] %vm475_vm3, %v544_v50 }
 0x2c7   : > { %v551_v56 = vmul.f32 %v545_v53, %v545_v53  ;;  %581 = vst.msk [vmem:[%s949_s9 + $0x8] sm:$0xff] %vm475_vm3, %v545_v53 }
 0x2c8   : > { %v552_v57 = vsub.f32 %v548_v51, %v550_v55 }
 0x2c9   : > { %v553_v58 = vsub.f32 %v549_v54, %v551_v56 }
 0x2ca   : > { %v554_v59 = vmax.f32 %v552_v57, 1e-09 }
 0x2cb   : > { %v555_v60 = vmax.f32 %v553_v58, 1e-09 }
 0x2cc   : > { %783 = vrsqrt.f32 %v554_v59  ;;  %vm563_vm12 = vcmp.eq.f32.partialorder %v554_v59, inf  ;;  %v566_v9 = vand.u32 2147483648, %v554_v59  ;;  %vm565_vm13 = vcmp.eq.f32.partialorder %v554_v59, 0.0 }
 0x2cd   : > { %785 = vrsqrt.f32 %v555_v60  ;;  %vm575_vm14 = vcmp.eq.f32.partialorder %v555_v60, inf  ;;  %v578_v11 = vand.u32 2147483648, %v555_v60  ;;  %vm577_vm15 = vcmp.eq.f32.partialorder %v555_v60, 0.0 }
 0x2d2   : > { %v784_v61 = vpop.eup %783 }
 0x2d3   : > { %v786_v62 = vpop.eup %785  ;;  %v557_v63 = vmul.f32 %v784_v61, %v554_v59 }
 0x2d4   : > { %v569_v0 = vmul.f32 %v786_v62, %v555_v60 }
 0x2d5   : > { %v558_v1 = vmul.f32 %v784_v61, %v557_v63 }
 0x2d6   : > { %v570_v2 = vmul.f32 %v786_v62, %v569_v0 }
 0x2d7   : > { %v559_v3 = vmul.f32 0.5, %v558_v1 }
 0x2d8   : > { %v571_v6 = vmul.f32 0.5, %v570_v2 }
 0x2d9   : > { %v560_v7 = vsub.f32 1.5, %v559_v3 }
 0x2da   : > { %v572_v8 = vsub.f32 1.5, %v571_v6 }
 0x2db   : > { %v561_v5 = vmul.f32 %v784_v61, %v560_v7 }
 0x2dc   : > { %v573_v10 = vmul.f32 %v786_v62, %v572_v8 }
 0x2dd   : > { %v562_v4 = vmul.f32 %v561_v5, %v554_v59 }
 0x2de   : > { %v574_v12 = vmul.f32 %v573_v10, %v555_v60 }
 0x2df   : > { %v564_v13 = vsel %vm563_vm12, %v554_v59, %v562_v4 }
 0x2e0   : > { %v567_v14 = vsel %vm565_vm13, %v566_v9, %v564_v13  ;;  %v576_v15 = vsel %vm575_vm14, %v555_v60, %v574_v12 }
 0x2e1   : > { %582 = vst.msk [vmem:[%s949_s9 + $0x10] sm:$0xff] %vm475_vm3, %v567_v14  ;;  %v579_v16 = vsel %vm577_vm15, %v578_v11, %v576_v15 }
 0x2e2   : > { %583 = vst.msk [vmem:[%s949_s9 + $0x18] sm:$0xff] %vm475_vm3, %v579_v16 }
 0x2e3 PF: > { %s15_s24 = sadd.s32 1, %s841_s24   ;;  %s1040_s18 = smov %s821_s19 }
 0x2e4   : > { %p12_p13 = scmp.ge.s32.totalorder %s15_s24, 6   ;;  %s1041_s19 = smov %s927_s6 }
 0x2e5   : > { %s1042_s20 = smov %s833_s22  ;;  %s1043_s21 = smov %s837_s23 }
 0x2e6   : > { %s1044_s22 = smov %s1047_s25  ;;  %s1045_s23 = smov %s1051_s26 }
 0x2e7   :  { %14 = sbr.rel (!%p12_p13) target bundleno = 4 (0x4), region = 124 }

</bundles_post_ra>
